<compile_context>
chip_gen: v5e
topology: v5e:2x2
jax: 0.10.0
libtpu: 0.0.40
codegen_flags: <defaults>
</compile_context>

<pallas_src>
import functools

import numpy as np
import jax
import jax.numpy as jnp
from jax.experimental import pallas as pl
from jax.experimental.pallas import tpu as pltpu


# ------------------------- contribute() glue (numpy) -------------------------
def _cubic_np(x):
    ax = np.abs(x)
    ax2 = ax * ax
    ax3 = ax2 * ax
    c1 = (ax <= 1).astype(np.float32)
    c2 = ((ax > 1) & (ax <= 2)).astype(np.float32)
    return (1.5 * ax3 - 2.5 * ax2 + 1.0) * c1 + \
           (-0.5 * ax3 + 2.5 * ax2 - 4.0 * ax + 2.0) * c2


def _contribute_1d(in_size, out_size, scale):
    """Replicates Bicubic.contribute() along one axis.
    Returns (weights [out, taps] f32, indices [out, taps] int32, 0-based)."""
    kernel_width = 4.0
    if scale < 1:
        kernel_width = 4.0 / scale
    x = np.arange(1, out_size + 1, dtype=np.float32)
    u = x / scale + 0.5 * (1.0 - 1.0 / scale)
    left = np.floor(u - kernel_width / 2.0)
    p = int(np.ceil(kernel_width) + 2)
    ind = left[:, None] + np.arange(p, dtype=np.float32)[None, :]
    mid = u[:, None] - ind
    if scale < 1:
        wgt = scale * _cubic_np(mid * scale)
    else:
        wgt = _cubic_np(mid)
    wgt = wgt / np.sum(wgt, axis=1, keepdims=True)
    ind = np.minimum(np.maximum(1.0, ind), float(in_size))
    keep = wgt[0] != 0.0                    # original code's row-0 kill quirk
    wgt = wgt[:, keep].astype(np.float32)
    idx = (ind[:, keep] - 1.0).astype(np.int32)
    return wgt, idx


def _dense_matrix(weights, indices, in_size):
    """Fold (weights, clamped indices) taps into a dense [out, in] matrix."""
    out_size, taps = weights.shape
    m = np.zeros((out_size, in_size), dtype=np.float32)
    rows = np.repeat(np.arange(out_size), taps)
    np.add.at(m, (rows, indices.reshape(-1)), weights.reshape(-1))
    return m


# --------------------------------- kernel ------------------------------------
def _bicubic_kernel(m0t_ref, m1t_ref, x_ref, o_ref):
    tn, h, w = x_ref.shape
    oh = m0t_ref.shape[1]
    ow = m1t_ref.shape[1]
    cdt = x_ref.dtype

    # ---- W pass: one whole-tile MXU matmul, contraction over lanes (w). ----
    x2 = x_ref[...].reshape(tn * h, w)                 # free leading-dim merge
    t = jnp.dot(x2, m1t_ref[...],
                preferred_element_type=jnp.float32)    # [tn*h, ow]  f32

    # ---- Bring h into lanes: one XLU transpose of the (already 1/scale
    #      smaller) intermediate; co-issues with MXU work. ----
    t3 = jnp.transpose(t.reshape(tn, h, ow), (0, 2, 1))   # [tn, ow, h]
    t2 = t3.reshape(tn * ow, h).astype(cdt)               # free leading merge

    # ---- H pass: second whole-tile MXU matmul. ----
    out2 = jnp.dot(t2, m0t_ref[...],
                   preferred_element_type=jnp.float32)    # [tn*ow, oh]

    # Stored as [tn, OW, OH]; the wrapper transposes the small output back.
    o_ref[...] = out2.reshape(tn, ow, oh).astype(o_ref.dtype)


# ------------------------------ tiling helpers --------------------------------
def _cdiv(a, b):
    return -(-a // b)


def _vmem_budget_bytes():
    try:
        cap = int(pltpu.get_tpu_info().vmem_capacity_bytes)
    except Exception:
        cap = 64 * 1024 * 1024          # v7x physical; conservative everywhere
    return max(16 * 1024 * 1024, (cap * 3) // 4)        # ~75% of physical


def _pick_plane_tile(n, h, w, oh, ow, in_bytes):
    """Plane tile `tn` and grid step count from a per-generation VMEM budget."""
    budget = _vmem_budget_bytes()
    # Weight matrices (double-buffered by the pipeliner).
    fixed = 2 * (h * oh + w * ow) * in_bytes
    # Per image plane: double-buffered input + double-buffered f32 output
    # + f32 intermediates of both passes (t, t^T, out2).
    per_plane = (2 * h * w * in_bytes + 2 * oh * ow * 4
                 + 3 * h * ow * 4 + ow * oh * 4)
    tn_vmem = max(1, (budget - fixed) // per_plane)
    # >= 4 grid steps (when the batch allows) so the input DMA overlaps the
    # MXU work and v7x's 2 TensorCores both get "parallel" steps, while never
    # padding the batch by more than one tile.
    steps = max(min(4, n), _cdiv(n, tn_vmem))
    tn = min(_cdiv(n, steps), tn_vmem)
    steps = _cdiv(n, tn)
    return int(tn), int(steps)


# -------------------------------- wrapper ------------------------------------
@functools.partial(jax.jit, static_argnames=("scale", "compute_dtype"))
def bicubic_forward(x, scale=0.25, compute_dtype=jnp.bfloat16):
    """x: [B, C, H, W] (NCHW, like PyTorch). Returns [B, C, OH, OW] float32."""
    b, c, h, w = x.shape
    oh, ow = int(h * scale), int(w * scale)

    w0, i0 = _contribute_1d(h, oh, scale)
    w1, i1 = _contribute_1d(w, ow, scale)
    m0t = jnp.asarray(_dense_matrix(w0, i0, h).T, dtype=compute_dtype)   # [H, OH]
    m1t = jnp.asarray(_dense_matrix(w1, i1, w).T, dtype=compute_dtype)   # [W, OW]

    n = b * c
    in_bytes = np.dtype(compute_dtype).itemsize
    tn, steps = _pick_plane_tile(n, h, w, oh, ow, in_bytes)
    npad = tn * steps

    xn = x.reshape(n, h, w).astype(compute_dtype)
    if npad != n:
        xn = jnp.pad(xn, ((0, npad - n), (0, 0), (0, 0)))

    flops = 2 * npad * (h * w * ow + ow * h * oh)
    bytes_accessed = (npad * h * w * in_bytes + npad * oh * ow * 4
                      + (h * oh + w * ow) * in_bytes)

    out = pl.pallas_call(
        _bicubic_kernel,
        out_shape=jax.ShapeDtypeStruct((npad, ow, oh), jnp.float32),
        grid_spec=pltpu.PrefetchScalarGridSpec(
            num_scalar_prefetch=0,
            grid=(steps,),
            in_specs=[
                pl.BlockSpec((h, oh), lambda i: (0, 0)),        # M0^T, resident
                pl.BlockSpec((w, ow), lambda i: (0, 0)),        # M1^T, resident
                pl.BlockSpec((tn, h, w), lambda i: (i, 0, 0)),  # image-plane tile
            ],
            out_specs=pl.BlockSpec((tn, ow, oh), lambda i: (i, 0, 0)),
        ),
        compiler_params=pltpu.CompilerParams(
            dimension_semantics=("parallel",),
            vmem_limit_bytes=_vmem_budget_bytes()),
        cost_estimate=pl.CostEstimate(
            flops=flops, transcendentals=0, bytes_accessed=bytes_accessed),
    )(m0t, m1t, xn)

    # Kernel emits [n, OW, OH]; transpose the small (1/16-sized) output back.
    return jnp.transpose(out[:n], (0, 2, 1)).reshape(b, c, oh, ow)


# ------------------------------- reference -----------------------------------
def _bicubic_reference(x, scale=0.25):
    """Literal JAX translation of the PyTorch gather-based forward."""
    b, c, h, w = x.shape
    oh, ow = int(h * scale), int(w * scale)
    w0, i0 = _contribute_1d(h, oh, scale)
    w1, i1 = _contribute_1d(w, ow, scale)
    w0 = jnp.asarray(w0); i0 = jnp.asarray(i0)
    w1 = jnp.asarray(w1); i1 = jnp.asarray(i1)
    out = x[:, :, i0, :] * w0[None, None, :, :, None]       # [b,c,OH,taps,w]
    out = out.sum(axis=3)                                    # [b,c,OH,w]
    a = jnp.transpose(out, (0, 1, 3, 2))                     # [b,c,w,OH]
    out = a[:, :, i1, :] * w1[None, None, :, :, None]        # [b,c,OW,taps,OH]
    out = jnp.transpose(out.sum(axis=3), (0, 1, 3, 2))       # [b,c,OH,OW]
    return out


if __name__ == "__main__":
    key = jax.random.PRNGKey(0)
    x = jax.random.normal(key, (2, 4, 16, 16), jnp.float32)  # NCHW like PyTorch

    ref = _bicubic_reference(x)                               # scale = 1/4

    # f32 compute path: bit-faithful to the gather-based reference.
    out_f32 = jax.block_until_ready(bicubic_forward(x, compute_dtype=jnp.float32))
    assert out_f32.shape == (2, 4, 4, 4), out_f32.shape
    err32 = float(jnp.max(jnp.abs(out_f32 - ref)))
    assert jnp.allclose(out_f32, ref, atol=1e-4, rtol=1e-4), err32

    # Default bf16-input path (f32 MXU accumulation): bandwidth-optimized.
    out_bf16 = jax.block_until_ready(bicubic_forward(x))
    errbf = float(jnp.max(jnp.abs(out_bf16 - ref)))
    assert jnp.allclose(out_bf16, ref, atol=5e-2, rtol=0.0), errbf

    print("KERNEL_OK")
</pallas_src>

<mosaic_0001>
module attributes {stable_mosaic.version = 11 : i64} {
  func.func @_bicubic_kernel(%arg0: i32, %arg1: memref<16x4xf32, #tpu.memory_space<vmem>>, %arg2: memref<16x4xf32, #tpu.memory_space<vmem>>, %arg3: memref<2x16x16xf32, #tpu.memory_space<vmem>>, %arg4: memref<2x4x4xf32, #tpu.memory_space<vmem>>) attributes {dimension_semantics = [#tpu.dimension_semantics<parallel>], iteration_bounds = array<i64: 4>, scalar_prefetch = 0 : i64, scratch_operands = 0 : i64, tpu.core_type = #tpu.core_type<tc>, window_params = [{pipeline_mode = #tpu.pipeline_mode<synchronous>, transform_indices = @transform_0, window_bounds = array<i64: 16, 4>}, {pipeline_mode = #tpu.pipeline_mode<synchronous>, transform_indices = @transform_1, window_bounds = array<i64: 16, 4>}, {transform_indices = @transform_2, window_bounds = array<i64: 2, 16, 16>}, {transform_indices = @transform_3, window_bounds = array<i64: 2, 4, 4>}]} {
    %c0 = arith.constant 0 : index
    %c0_0 = arith.constant 0 : index
    %c0_1 = arith.constant 0 : index
    %0 = vector.load %arg3[%c0, %c0_0, %c0_1] : memref<2x16x16xf32, #tpu.memory_space<vmem>>, vector<2x16x16xf32>
    %1 = vector.shape_cast %0 : vector<2x16x16xf32> to vector<32x16xf32>
    %c0_2 = arith.constant 0 : index
    %c0_3 = arith.constant 0 : index
    %2 = vector.load %arg2[%c0_2, %c0_3] : memref<16x4xf32, #tpu.memory_space<vmem>>, vector<16x4xf32>
    %cst = arith.constant dense<0.000000e+00> : vector<32x4xf32>
    %3 = tpu.matmul %1, %2, %cst {dimension_numbers = #tpu.dot_dimension_numbers<[1], [0], [0], [1], [0, 0, 1, 1], [], []>} : vector<32x16xf32>, vector<16x4xf32>, vector<32x4xf32> -> vector<32x4xf32>
    %4 = vector.shape_cast %3 : vector<32x4xf32> to vector<2x16x4xf32>
    %5 = tpu.transpose %4, [0, 2, 1] : vector<2x16x4xf32> -> vector<2x4x16xf32>
    %6 = vector.shape_cast %5 : vector<2x4x16xf32> to vector<8x16xf32>
    %c0_4 = arith.constant 0 : index
    %c0_5 = arith.constant 0 : index
    %7 = vector.load %arg1[%c0_4, %c0_5] : memref<16x4xf32, #tpu.memory_space<vmem>>, vector<16x4xf32>
    %cst_6 = arith.constant dense<0.000000e+00> : vector<8x4xf32>
    %8 = tpu.matmul %6, %7, %cst_6 {dimension_numbers = #tpu.dot_dimension_numbers<[1], [0], [0], [1], [0, 0, 1, 1], [], []>} : vector<8x16xf32>, vector<16x4xf32>, vector<8x4xf32> -> vector<8x4xf32>
    %9 = vector.shape_cast %8 : vector<8x4xf32> to vector<2x4x4xf32>
    %c0_7 = arith.constant 0 : index
    %c0_8 = arith.constant 0 : index
    %c0_9 = arith.constant 0 : index
    %10 = vector.load %arg4[%c0_7, %c0_8, %c0_9] : memref<2x4x4xf32, #tpu.memory_space<vmem>>, vector<2x4x4xf32>
    tpu.vector_store %arg4[%c0_7, %c0_8, %c0_9], %9 {strides = array<i32>} : memref<2x4x4xf32, #tpu.memory_space<vmem>>, vector<2x4x4xf32>,
    return
  }
  func.func @transform_0(%arg0: i32) -> (i32, i32) {
    %c0_i32 = arith.constant 0 : i32
    %c0_i32_0 = arith.constant 0 : i32
    %c0_i32_1 = arith.constant 0 : i32
    return %c0_i32, %c0_i32_0 : i32, i32
  }
  func.func @transform_1(%arg0: i32) -> (i32, i32) {
    %c0_i32 = arith.constant 0 : i32
    %c0_i32_0 = arith.constant 0 : i32
    %c0_i32_1 = arith.constant 0 : i32
    return %c0_i32, %c0_i32_0 : i32, i32
  }
  func.func @transform_2(%arg0: i32) -> (i32, i32, i32) {
    %c0_i32 = arith.constant 0 : i32
    %c0_i32_0 = arith.constant 0 : i32
    %c0_i32_1 = arith.constant 0 : i32
    return %arg0, %c0_i32, %c0_i32_0 : i32, i32, i32
  }
  func.func @transform_3(%arg0: i32) -> (i32, i32, i32) {
    %c0_i32 = arith.constant 0 : i32
    %c0_i32_0 = arith.constant 0 : i32
    %c0_i32_1 = arith.constant 0 : i32
    return %arg0, %c0_i32, %c0_i32_0 : i32, i32, i32
  }
}

</mosaic_0001>

<bundles_post_ra>
// kernel: bicubic_forward.1
= control target key start
LH: loop header
LB: loop body
LE: loop exit
PB: predicated region body
PF: predicated region fallthrough
CT: control target
= control target key end

     0   :  { %8 = vsyncpa [#allocation3], 0  ;;  %s838_s0 = inlined_call_operand.hbm [shape: f32[16,4], index: 0, kind: input, shape index: {}, may-alias: {0,1}]   ;;  %s839_s1 = inlined_call_operand.hbm [shape: f32[16,4], index: 1, kind: input, shape index: {}, may-alias: {0,1}]   ;;  %s840_s2 = inlined_call_operand.hbm [shape: f32[8,16,16], index: 2, kind: input, shape index: {}]   ;;  %s841_s3 = inlined_call_operand.vmem [shape: f32[8,4,4], index: 3, kind: output, shape index: {}]  }
   0x1   :  { %9 = vsyncpa [#allocation5], 0  ;;  %s711_s12 = smov 0   ;;  %s713_s13 = smov 0  }
   0x2   :  { %s715_s14 = smov 0   ;;  %s717_s15 = smov 0  }
   0x3 LB: > { %s730_s16 = sadd.s32 4294967295, %s685_s15   ;;  %p77_p0 = scmp.ne.s32.totalorder %s677_s13, %s673_s12  ;;  %s685_s15 = sphi %s717_s15, %s848_s15   ;;  %s681_s14 = sphi %s715_s14, %s847_s14   ;;  %s677_s13 = sphi %s713_s13, %s846_s13   ;;  %s673_s12 = sphi %s711_s12, %s845_s12  }
   0x4   : > { %p78_p1 = scmp.eq.s32.totalorder %s730_s16, 0  ;;  %p463_p2 = scmp.ge.s32.totalorder %s685_s15, 1 }
   0x5   : > { %p114_p3 = scmp.lt.s32.totalorder %s685_s15, 5  ;;  %s125_s20 = sshll.u32 %s838_s0, 4  ;;  %s126_s20 = int_to_ptr.hbm [resolvable:$true] %s125_s20 }
   0x6   : > { %p738_p4 = por %p78_p1, %p77_p0  ;;  %s687_s22 = smov [#allocation2]  }
   0x7   : > { %p745_p5 = pnand %p463_p2, %p114_p3  ;;  %s127_s23 = sshll.u32 %s687_s22, 4  ;;  %s128_s23 = int_to_ptr.vmem [resolvable:$true] %s127_s23 }
   0x8   : > { %s139_s26 = sshll.u32 %s839_s1, 4  ;;  %s688_s27 = smov 128   ;;  %s140_s26 = int_to_ptr.hbm [resolvable:$true] %s139_s26 }
   0x9   : > { %p500_p6 = pneg %p745_p5  ;;  %s689_s28 = smov 8  }
   0xa   : > { %s690_s29 = smov [#allocation4]   ;;  %s763_s4 = sadd.s32 1, %s685_s15  }
   0xb   : > { %p501_p7 = pnand %p500_p6, %p78_p1  ;;  %s141_s30 = sshll.u32 %s690_s29, 4  ;;  %s142_s30 = int_to_ptr.vmem [resolvable:$true] %s141_s30 }
   0xc   : > { %s64_s5 = sadd.s32 1, %s681_s14  ;;  %s61_s6 = ssub.s32 %s685_s15, %s763_s4 }
   0xd   : > { %503 = dma.hbm_to_vmem [thread:$0]  (!%p501_p7), %s126_s20, 256, %s128_s23, [#allocation3], %s688_s27, %s688_s27, %s689_s28  }
   0xe   : > { %506 = dma.hbm_to_vmem [thread:$0]  (!%p501_p7), %s140_s26, 256, %s142_s30, [#allocation5], %s688_s27, %s688_s27, %s689_s28  }
   0xf   : > { %p71_p8 = scmp.ne.s32.totalorder %s681_s14, %s677_s13  ;;  %p62_p9 = scmp.eq.s32.totalorder %s61_s6, 0 }
  0x10   : > { %p72_p10 = scmp.eq.s32.totalorder %s685_s15, 0  ;;  %p513_p11 = scmp.lt.s32.totalorder %s685_s15, 4 }
  0x11   : > { %s155_s7 = sand.u32 1, %s685_s15   ;;  %s157_s9 = sand.u32 1, %s681_s14  }
  0x12   : > { %s774_s8 = scalar_select %p62_p9, %s681_s14, %s64_s5  }
  0x13   : > { %p73_p12 = por %p72_p10, %p71_p8  ;;  %s485_s10 = sshll.u32 %s685_s15, 5 }
  0x14   : > { %s467_s11 = sshll.u32 %s157_s9, 5  ;;  %s165_s19 = scalar_lea.hbm %s840_s2, %s485_s10 }
  0x15   : > { %s166_s20 = sshll.u32 %s165_s19, 4  ;;  %s159_s22 = scalar_lea.vmem [#allocation6], %s467_s11  ;;  %s167_s20 = int_to_ptr.hbm [resolvable:$true] %s166_s20 }
  0x16   : > { %s168_s23 = sshll.u32 %s159_s22, 4  ;;  %p783_p13 = pnand %p513_p11, %p73_p12  ;;  %s169_s23 = int_to_ptr.vmem [resolvable:$true] %s168_s23 }
  0x17   : > { %s156_s25 = scalar_lea.sflag [#allocation3], %s155_s7  ;;  %s613_s26 = sshra.s32 %s167_s20, 4  ;;  %s614_s26 = int_to_ptr.hbm [resolvable:$true] %s613_s26 }
  0x18   : > { %s615_s29 = scalar_lea.hbm %s614_s26, 32  ;;  %p617_p2 = pneg %p783_p13 }
  0x19   : > { %p616_p0 = scmp.ne.s32.totalorder %s614_s26, %s615_s29  ;;  %s620_s6 = scalar_lea.hbm %s840_s2, 128 }
  0x1a   : > { %p621_p7 = scmp.lt.s32.totalorder %s614_s26, %s840_s2  ;;  %p622_p8 = scmp.lt.s32.totalorder %s620_s6, %s615_s29 }
  0x1b   : > { %p618_p3 = pnand %p617_p2, %p616_p0 }
  0x1c   : > { %p623_p9 = por %p622_p8, %p621_p7 }
  0x1d   : > { %p619_p6 = pneg %p618_p3 }
  0x1f   : > { %p624_p10 = pnand %p623_p9, %p619_p6 }
  0x21   : > { %627 = shalt.err (!%p624_p10)
}
  0x22   : > { %510 = dma.hbm_to_vmem [thread:$0]  (!%p783_p13), %s167_s20, 512, %s169_s23, %s156_s25, %s688_s27, %s688_s27, %s689_s28  }
  0x23   : > { %180 = sbr.rel (%p745_p5) target bundleno = 493 (0x1ed), region = 32 }
  0x28   : > { %660 = dma.done.wait (%p78_p1), [#allocation3], 256  }
  0x29   : > { %662 = vsyncadd (%p78_p1), [#allocation3], 4294967040 }
  0x2a   : > { %664 = dma.done.wait (%p78_p1), [#allocation5], 256  }
  0x2b   : > { %666 = vsyncadd (%p78_p1), [#allocation5], 4294967040  ;;  %s192_s7 = sand.u32 1, %s730_s16   ;;  %s194_s27 = sand.u32 1, %s677_s13  }
  0x2c   : > { %s474_s28 = sshll.u32 %s194_s27, 5  ;;  %s193_s21 = scalar_lea.sflag [#allocation3], %s192_s7 }
  0x2d   : > { %s196_s10 = scalar_lea.vmem [#allocation6], %s474_s28 }
  0x2e   : > { %668 = dma.done.wait (%p738_p4), %s193_s21, 512  }
  0x2f   : > { %670 = vsyncadd (%p738_p4), %s193_s21, 4294966784  ;;  %v232_v0 = vld [vmem:[#allocation4 + $0x8] sm:$0xff]  ;;  %v231_v1 = vld [vmem:[#allocation4] sm:$0xff]  ;;  %vm233_vm0 = vcmask 130048   ;;  %s475_s17 = sshll.u32 %s730_s16, 1  ;;  %vm372_vm1 = vcmask 27648  }
  0x30   : > { %260 = vmatpush.msra.mxu0 %v232_v0  ;;  %486 = vmatpush.msra.mxu2 %v232_v0  ;;  %v227_v2 = vld [vmem:[%s196_s10] sm:$0xff]  ;;  %v228_v3 = vld [vmem:[%s196_s10 + $0x8] sm:$0xff]  ;;  %v230_v4 = vld [vmem:[%s196_s10 + $0x18] sm:$0xff]  ;;  %p222_p1 = scmp.lt.s32.totalorder %s475_s17, 7 }
  0x31   : > { %487 = vmatpush.msra.mxu3 %v232_v0  ;;  %v229_v5 = vld [vmem:[%s196_s10 + $0x10] sm:$0xff]  ;;  %v340_v10 = vld [vmem:[#allocation2 + $0x8] sm:$0xff]  ;;  %v339_v11 = vld [vmem:[#allocation2] sm:$0xff] }
  0x32   : > { %261 = vmatpush.msra.mxu0 %v231_v1  ;;  %488 = vmatpush.msra.mxu2 %v231_v1  ;;  %s850_s17 = smov (!%p222_p1, %s475_s17), 7 }
  0x33   : > { %477 = vmatmul.msk.f32.vlgmr.msra.gmra.mxu0 %vm233_vm0, %v227_v2  ;;  %478 = vmatmul.msk.f32.vlgmr.msra.gmra.mxu2 %vm233_vm0, %v228_v3  ;;  %s476_s11 = sshll.u32 %s850_s17, 2 }
  0x34   : > { %489 = vmatpush.msra.mxu3 %v231_v1  ;;  %363 = vmatpush.msra.mxu1 %v340_v10  ;;  %s225_s19 = scalar_lea.vmem %s841_s3, %s476_s11 }
  0x35   : > { %480 = vmatmul.msk.f32.vlgmr.msra.gmra.mxu3 %vm233_vm0, %v230_v4 }
  0x36   : > { %364 = vmatpush.msra.mxu1 %v339_v11 }
  0x3b   : > { %479 = vmatmul.msk.f32.gmra.mxu2 %vm233_vm0, %v229_v5 }
  0xb0   : > { %v263_v6 = vpop.f32.mrf.mxu0 }
  0xb1   : > { %275 = vxpose.xlu0.b32.start [1/2] (short) (narrow) %v263_v6, 8 }
  0xb6   : > { %v266_v7 = vpop.f32.mrf.mxu2 }
  0xb8   : > { %v272_v9 = vpop.f32.mrf.mxu3 }
  0xb9   : > { %276 = vxpose.xlu0.b32.end [2/2] (short) (narrow) %v266_v7, 8 }
  0xbe   : > { %v269_v8 = vpop.f32.mrf.mxu2 }
  0xbf   : > { %307 = vxpose.xlu1.b32.start [1/2] (short) (narrow) %v269_v8, 8 }
  0xc7   : > { %308 = vxpose.xlu1.b32.end [2/2] (short) (narrow) %v272_v9, 8 }
 0x155   : > { %v291_v12 = vpop.trf.xlu0 }
 0x156   : > { %343 = vst [vmem:[#allocation1] ss:$2 sm:$0xff] %v291_v12 }
 0x163   : > { %v323_v13 = vpop.trf.xlu1 }
 0x164   : > { %345 = vst [vmem:[#allocation1 + $0x1] ss:$2 sm:$0xff] %v323_v13 }
 0x16b   : > { %v346_v14 = vld.sshfl [vmem:[#allocation1] sm:$0xff pattern:$0x75316420] }
 0x16c   : > { %481 = vmatmul.msk.f32.vlgmr.msra.gmra.mxu1 %vm233_vm0, %v346_v14 }
 0x1e9   : > { %v366_v15 = vpop.f32.mrf.mxu1 }
 0x1ea   : > { %v370_v16 = vrot.slane %v366_v15, 4  ;;  %373 = vst.msk [vmem:[%s225_s19] sm:$0xf] %vm372_vm1, %v366_v15 }
 0x1ec   : > { %374 = vst.msk [vmem:[%s225_s19 + $0x4] sm:$0xf] %vm372_vm1, %v370_v16 }
 0x1ed PF: > { %p12_p4 = scmp.ge.s32.totalorder %s763_s4, 6   ;;  %s845_s12 = smov %s677_s13 }
 0x1ee   : > { %s846_s13 = smov %s681_s14  ;;  %s847_s14 = smov %s774_s8 }
 0x1ef   : > { %s848_s15 = smov %s763_s4  ;;  %14 = sbr.rel (!%p12_p4) target bundleno = 3 (0x3), region = 80 }
 0x1f4   :  { %397 = vsyncpa [#allocation3], 1 }
 0x1f5   :  { %399 = vsyncpa [#allocation3 + $0x1], 1 }
 0x1f6   :  { %400 = vsyncpa [#allocation5], 1 }

</bundles_post_ra>
